<compile_context>
chip_gen: v7x
topology: tpu7x:2x2x1
jax: 0.10.0
libtpu: 0.0.40
codegen_flags: <defaults>
</compile_context>

<pallas_src>
import jax
import jax.numpy as jnp
from jax.experimental import pallas as pl
from jax.experimental.pallas import tpu as pltpu

F_IN = 784          # 28*28 (fed un-padded; Mosaic lane-pads K internally in VMEM)
HIDDEN = 128
N_OUT = 10
N_PAD = 128         # lane-dense output width (unmasked vst); sliced to 10 in wrapper
TILE_B_MAX = 1024   # keeps f32 x double-buffer within default scoped VMEM everywhere


def _round_up(n, m):
    return ((n + m - 1) // m) * m


def _choose_tile_b(B):
    """Batch tile: full batch for small B (block == full dim is always legal);
    otherwise >=2 grid steps (v7x megacore) with sublane/pack-friendly rows."""
    if B <= 256:
        return B
    tile_b = _round_up(pl.cdiv(B, 2), 16)
    return min(tile_b, TILE_B_MAX)


def mlp_kernel(x_ref, w1_ref, b1_ref, w2_ref, b2_ref, o_ref):
    # Layer 1: cast the f32 activation tile to bf16 in VMEM (no extra HBM
    # traffic), bf16 x bf16 MXU matmul with f32 accumulation.
    x_bf16 = x_ref[...].astype(jnp.bfloat16)
    h = jnp.dot(x_bf16, w1_ref[...], preferred_element_type=jnp.float32)
    h = jnp.maximum(h + b1_ref[...], 0.0)               # f32 bias + ReLU (VPU)
    # Layer 2: tiny (128x128) and hidden under the x DMA -> keep it fully f32.
    y = jnp.dot(h, w2_ref[...], preferred_element_type=jnp.float32)
    o_ref[...] = (y + b2_ref[...]).astype(o_ref.dtype)  # bf16 lane-dense writeback


def simple_nn_forward(x_nchw, w1, b1, w2, b2):
    """x_nchw: (B, 1, 28, 28) float32.  w1: (784,128), b1: (1,128) or (128,),
    w2: (128,10), b2: (1,10) or (10,).  Returns logits (B, 10) float32."""
    B = x_nchw.shape[0]
    x = x_nchw.reshape(B, -1).astype(jnp.float32)       # flatten only; no padding
    assert x.shape[1] == F_IN

    tile_b = _choose_tile_b(B)
    grid = (pl.cdiv(B, tile_b),)                        # ragged final block masked

    # Resident operands (tiny; prepared once in the wrapper).
    w1_bf = w1.astype(jnp.bfloat16)                     # (784, 128) bf16
    b1_f = b1.astype(jnp.float32).reshape(1, HIDDEN)    # (1, 128) f32
    w2_p = jnp.zeros((HIDDEN, N_PAD), jnp.float32).at[:, :N_OUT].set(
        w2.astype(jnp.float32))                         # (128, 128) f32
    b2_p = jnp.zeros((1, N_PAD), jnp.float32).at[:, :N_OUT].set(
        b2.astype(jnp.float32).reshape(1, N_OUT))       # (1, 128) f32

    cost = pl.CostEstimate(
        flops=2 * B * F_IN * HIDDEN + 2 * B * HIDDEN * N_PAD,
        transcendentals=0,
        bytes_accessed=(B * F_IN * 4            # x read (f32, un-padded)
                        + B * N_PAD * 2         # logits write (bf16)
                        + F_IN * HIDDEN * 2     # W1 bf16
                        + HIDDEN * 4            # b1 f32
                        + HIDDEN * N_PAD * 4    # W2 f32
                        + N_PAD * 4),           # b2 f32
    )

    out = pl.pallas_call(
        mlp_kernel,
        out_shape=jax.ShapeDtypeStruct((B, N_PAD), jnp.bfloat16),
        grid_spec=pltpu.PrefetchScalarGridSpec(
            num_scalar_prefetch=0,
            grid=grid,
            in_specs=[
                pl.BlockSpec((tile_b, F_IN), lambda i: (i, 0)),   # x tile (pipelined)
                pl.BlockSpec((F_IN, HIDDEN), lambda i: (0, 0)),   # W1 (resident)
                pl.BlockSpec((1, HIDDEN), lambda i: (0, 0)),      # b1 (resident)
                pl.BlockSpec((HIDDEN, N_PAD), lambda i: (0, 0)),  # W2 (resident)
                pl.BlockSpec((1, N_PAD), lambda i: (0, 0)),       # b2 (resident)
            ],
            out_specs=pl.BlockSpec((tile_b, N_PAD), lambda i: (i, 0)),
        ),
        compiler_params=pltpu.CompilerParams(
            dimension_semantics=("parallel",),   # batch tiles: megacore-shardable
        ),
        cost_estimate=cost,
    )(x, w1_bf, b1_f, w2_p, b2_p)

    return out[:, :N_OUT].astype(jnp.float32)


def init_params(key):
    # Deterministic synthetic init (shapes follow nn.Linear(784,128), nn.Linear(128,10)).
    k1, k2, k3, k4 = jax.random.split(key, 4)
    w1 = jax.random.normal(k1, (784, 128), jnp.float32) * 0.02
    b1 = jax.random.normal(k2, (1, 128), jnp.float32) * 0.01
    w2 = jax.random.normal(k3, (128, 10), jnp.float32) * 0.02
    b2 = jax.random.normal(k4, (1, 10), jnp.float32) * 0.01
    return w1, b1, w2, b2


if __name__ == "__main__":
    key = jax.random.PRNGKey(0)
    kx, kp = jax.random.split(key)
    # Small MNIST-shaped batch: (B, C, H, W) = (4, 1, 28, 28) NCHW -> 784 features.
    x = jax.random.normal(kx, (4, 1, 28, 28), jnp.float32)
    w1, b1, w2, b2 = init_params(kp)

    logits = simple_nn_forward(x, w1, b1, w2, b2)
    jax.block_until_ready(logits)
    assert logits.shape == (4, 10)

    # Reference mirroring the kernel's math (bf16 x/W1, f32 accumulate, f32 layer 2).
    def _bf(a):
        return a.astype(jnp.bfloat16).astype(jnp.float32)

    xf = x.reshape(x.shape[0], -1)
    h_ref = jnp.maximum(_bf(xf) @ _bf(w1) + b1, 0.0)
    ref = h_ref @ w2 + b2
    assert jnp.allclose(logits, ref, atol=1e-2, rtol=2e-2), (
        jnp.max(jnp.abs(logits - ref)))

    # Sanity check against the pure-f32 PyTorch-equivalent forward.
    ref_f32 = jnp.maximum(xf @ w1 + b1, 0.0) @ w2 + b2
    assert jnp.allclose(logits, ref_f32, atol=3e-2, rtol=3e-2), (
        jnp.max(jnp.abs(logits - ref_f32)))

    print("KERNEL_OK")
</pallas_src>

<mosaic_0001>
module attributes {stable_mosaic.version = 11 : i64} {
  func.func @mlp_kernel(%arg0: i32, %arg1: memref<4x784xf32, #tpu.memory_space<vmem>>, %arg2: memref<784x128xbf16, #tpu.memory_space<vmem>>, %arg3: memref<1x128xf32, #tpu.memory_space<vmem>>, %arg4: memref<128x128xf32, #tpu.memory_space<vmem>>, %arg5: memref<1x128xf32, #tpu.memory_space<vmem>>, %arg6: memref<4x128xbf16, #tpu.memory_space<vmem>>) attributes {dimension_semantics = [#tpu.dimension_semantics<parallel>], iteration_bounds = array<i64: 1>, scalar_prefetch = 0 : i64, scratch_operands = 0 : i64, tpu.core_type = #tpu.core_type<tc>, window_params = [{transform_indices = @transform_0, window_bounds = array<i64: 4, 784>}, {pipeline_mode = #tpu.pipeline_mode<synchronous>, transform_indices = @transform_1, window_bounds = array<i64: 784, 128>}, {pipeline_mode = #tpu.pipeline_mode<synchronous>, transform_indices = @transform_2, window_bounds = array<i64: 1, 128>}, {pipeline_mode = #tpu.pipeline_mode<synchronous>, transform_indices = @transform_3, window_bounds = array<i64: 128, 128>}, {pipeline_mode = #tpu.pipeline_mode<synchronous>, transform_indices = @transform_4, window_bounds = array<i64: 1, 128>}, {transform_indices = @transform_5, window_bounds = array<i64: 4, 128>}]} {
    %c0 = arith.constant 0 : index
    %c0_0 = arith.constant 0 : index
    %0 = vector.load %arg1[%c0, %c0_0] : memref<4x784xf32, #tpu.memory_space<vmem>>, vector<4x784xf32>
    %1 = arith.truncf %0 : vector<4x784xf32> to vector<4x784xbf16>
    %c0_1 = arith.constant 0 : index
    %c0_2 = arith.constant 0 : index
    %2 = vector.load %arg2[%c0_1, %c0_2] : memref<784x128xbf16, #tpu.memory_space<vmem>>, vector<784x128xbf16>
    %cst = arith.constant dense<0.000000e+00> : vector<4x128xf32>
    %3 = tpu.matmul %1, %2, %cst {dimension_numbers = #tpu.dot_dimension_numbers<[1], [0], [0], [1], [0, 0, 1, 1], [], []>} : vector<4x784xbf16>, vector<784x128xbf16>, vector<4x128xf32> -> vector<4x128xf32>
    %c0_3 = arith.constant 0 : index
    %c0_4 = arith.constant 0 : index
    %4 = vector.load %arg3[%c0_3, %c0_4] : memref<1x128xf32, #tpu.memory_space<vmem>>, vector<1x128xf32>
    %5 = vector.broadcast %4 : vector<1x128xf32> to vector<4x128xf32>
    %6 = arith.addf %3, %5 : vector<4x128xf32>
    %cst_5 = arith.constant 0.000000e+00 : f32
    %7 = vector.broadcast %cst_5 : f32 to vector<4x128xf32>
    %8 = arith.maximumf %6, %7 : vector<4x128xf32>
    %c0_6 = arith.constant 0 : index
    %c0_7 = arith.constant 0 : index
    %9 = vector.load %arg4[%c0_6, %c0_7] : memref<128x128xf32, #tpu.memory_space<vmem>>, vector<128x128xf32>
    %cst_8 = arith.constant dense<0.000000e+00> : vector<4x128xf32>
    %10 = tpu.matmul %8, %9, %cst_8 {dimension_numbers = #tpu.dot_dimension_numbers<[1], [0], [0], [1], [0, 0, 1, 1], [], []>} : vector<4x128xf32>, vector<128x128xf32>, vector<4x128xf32> -> vector<4x128xf32>
    %c0_9 = arith.constant 0 : index
    %c0_10 = arith.constant 0 : index
    %11 = vector.load %arg5[%c0_9, %c0_10] : memref<1x128xf32, #tpu.memory_space<vmem>>, vector<1x128xf32>
    %12 = vector.broadcast %11 : vector<1x128xf32> to vector<4x128xf32>
    %13 = arith.addf %10, %12 : vector<4x128xf32>
    %14 = arith.truncf %13 : vector<4x128xf32> to vector<4x128xbf16>
    %c0_11 = arith.constant 0 : index
    %c0_12 = arith.constant 0 : index
    %15 = vector.load %arg6[%c0_11, %c0_12] : memref<4x128xbf16, #tpu.memory_space<vmem>>, vector<4x128xbf16>
    tpu.vector_store %arg6[%c0_11, %c0_12], %14 {strides = array<i32>} : memref<4x128xbf16, #tpu.memory_space<vmem>>, vector<4x128xbf16>,
    return
  }
  func.func @transform_0(%arg0: i32) -> (i32, i32) {
    %c0_i32 = arith.constant 0 : i32
    %c0_i32_0 = arith.constant 0 : i32
    return %arg0, %c0_i32 : i32, i32
  }
  func.func @transform_1(%arg0: i32) -> (i32, i32) {
    %c0_i32 = arith.constant 0 : i32
    %c0_i32_0 = arith.constant 0 : i32
    %c0_i32_1 = arith.constant 0 : i32
    return %c0_i32, %c0_i32_0 : i32, i32
  }
  func.func @transform_2(%arg0: i32) -> (i32, i32) {
    %c0_i32 = arith.constant 0 : i32
    %c0_i32_0 = arith.constant 0 : i32
    %c0_i32_1 = arith.constant 0 : i32
    return %c0_i32, %c0_i32_0 : i32, i32
  }
  func.func @transform_3(%arg0: i32) -> (i32, i32) {
    %c0_i32 = arith.constant 0 : i32
    %c0_i32_0 = arith.constant 0 : i32
    %c0_i32_1 = arith.constant 0 : i32
    return %c0_i32, %c0_i32_0 : i32, i32
  }
  func.func @transform_4(%arg0: i32) -> (i32, i32) {
    %c0_i32 = arith.constant 0 : i32
    %c0_i32_0 = arith.constant 0 : i32
    %c0_i32_1 = arith.constant 0 : i32
    return %c0_i32, %c0_i32_0 : i32, i32
  }
  func.func @transform_5(%arg0: i32) -> (i32, i32) {
    %c0_i32 = arith.constant 0 : i32
    %c0_i32_0 = arith.constant 0 : i32
    return %arg0, %c0_i32 : i32, i32
  }
}

</mosaic_0001>

<bundles_post_ra>
// kernel: tpu_custom_call.1
= control target key start
LH: loop header
LB: loop body
LE: loop exit
PB: predicated region body
PF: predicated region fallthrough
CT: control target
= control target key end

     0   :  { %10 = vsyncpa [#allocation3], 0  ;;  %s1212_s0 = inlined_call_operand.hbm [shape: f32[4,784], index: 0, kind: input, shape index: {}]   ;;  %s1213_s1 = inlined_call_operand.hbm [shape: bf16[784,128], index: 1, kind: input, shape index: {}]   ;;  %s1214_s2 = inlined_call_operand.vmem [shape: f32[1,128], index: 2, kind: input, shape index: {}]   ;;  %s1215_s3 = inlined_call_operand.hbm [shape: f32[128,128], index: 3, kind: input, shape index: {}]   ;;  %s1216_s4 = inlined_call_operand.vmem [shape: f32[1,128], index: 4, kind: input, shape index: {}]   ;;  %s1217_s5 = inlined_call_operand.hbm [shape: bf16[4,128], index: 5, kind: output, shape index: {}]  }
   0x1   :  { %11 = vsyncpa [#allocation6], 0 }
   0x2   :  { %12 = vsyncpa [#allocation4], 0  ;;  %s1115_s18 = smov [#allocation5]   ;;  %s1021_s22 = scalar_lea.hbm %s1213_s1, 6272 }
   0x3   :  { %s28_s19 = sshll.u32 %s1115_s18, 4  ;;  %p1022_p0 = scmp.ne.s32.totalorder %s1213_s1, %s1021_s22  ;;  %s29_s19 = int_to_ptr.vmem [resolvable:$true] %s28_s19 }
   0x4   :  { %p1025_p1 = scmp.lt.u32.totalorder %s1021_s22, %s1213_s1 }
   0x6   :  { %p1027_p2 = pnand %p1025_p1, %p1022_p0 }
   0x8   :  { %1030 = shalt.err (!%p1027_p2)
}
   0x9   :  { %s1031_s27 = scalar_lea.vmem %s29_s19, 6272  ;;  %p1036_p4 = scmp.lt.s32.totalorder %s29_s19, %s29_s19 }
   0xa   :  { %p1032_p3 = scmp.ne.s32.totalorder %s29_s19, %s1031_s27  ;;  %p1037_p5 = scmp.lt.s32.totalorder %s1031_s27, %s1031_s27 }
   0xc   :  { %p1038_p6 = por %p1037_p5, %p1036_p4 }
   0xe   :  { %p1039_p7 = pnand %p1038_p6, %p1032_p3 }
  0x10   :  { %1042 = shalt.err (!%p1039_p7)
}
  0x11   :  { %s1116_s28 = smov 64   ;;  %s1117_s29 = smov 4  }
  0x12   :  { %34 = dma.hbm_to_vmem [thread:$0]  %s1213_s1, 6272, %s29_s19, [#allocation6], %s1116_s28, %s1116_s28, %s1117_s29  }
  0x13   :  { %s1118_s7 = smov [#allocation2]   ;;  %s1119_s9 = smov [#allocation7]  }
  0x14   :  { %s19_s8 = sshll.u32 %s1118_s7, 4  ;;  %s42_s10 = sshll.u32 %s1119_s9, 4  ;;  %s20_s8 = int_to_ptr.vmem [resolvable:$true] %s19_s8  ;;  %s43_s10 = int_to_ptr.vmem [resolvable:$true] %s42_s10 }
  0x15   :  { %s1043_s13 = scalar_lea.hbm %s1212_s0, 448 }
  0x16   :  { %p1044_p8 = scmp.ne.s32.totalorder %s1212_s0, %s1043_s13  ;;  %p1047_p9 = scmp.lt.u32.totalorder %s1043_s13, %s1212_s0 }
  0x18   :  { %p1049_p10 = pnand %p1047_p9, %p1044_p8 }
  0x1a   :  { %1052 = shalt.err (!%p1049_p10)
}
  0x1b   :  { %s1053_s1 = scalar_lea.vmem %s20_s8, 448  ;;  %p1058_p12 = scmp.lt.s32.totalorder %s20_s8, %s20_s8 }
  0x1c   :  { %p1054_p11 = scmp.ne.s32.totalorder %s20_s8, %s1053_s1  ;;  %p1059_p13 = scmp.lt.s32.totalorder %s1053_s1, %s1053_s1 }
  0x1e   :  { %p1060_p0 = por %p1059_p13, %p1058_p12 }
  0x20   :  { %p1061_p1 = pnand %p1060_p0, %p1054_p11 }
  0x22   :  { %1064 = shalt.err (!%p1061_p1)
}
  0x23   :  { %22 = dma.hbm_to_vmem [thread:$0]  %s1212_s0, 448, %s20_s8, [#allocation3]  }
  0x24   :  { %s1065_s22 = scalar_lea.hbm %s1215_s3, 2048 }
  0x25   :  { %p1066_p2 = scmp.ne.s32.totalorder %s1215_s3, %s1065_s22  ;;  %p1069_p3 = scmp.lt.u32.totalorder %s1065_s22, %s1215_s3 }
  0x27   :  { %p1071_p4 = pnand %p1069_p3, %p1066_p2 }
  0x29   :  { %1074 = shalt.err (!%p1071_p4)
}
  0x2a   :  { %s1075_s27 = scalar_lea.vmem %s43_s10, 2048  ;;  %p1080_p6 = scmp.lt.s32.totalorder %s43_s10, %s43_s10 }
  0x2b   :  { %p1076_p5 = scmp.ne.s32.totalorder %s43_s10, %s1075_s27  ;;  %p1081_p7 = scmp.lt.s32.totalorder %s1075_s27, %s1075_s27 }
  0x2d   :  { %p1082_p8 = por %p1081_p7, %p1080_p6 }
  0x2f   :  { %p1083_p9 = pnand %p1082_p8, %p1076_p5 }
  0x31   :  { %1086 = shalt.err (!%p1083_p9)
}
  0x32   :  { %s1120_s0 = smov 128   ;;  %s1121_s28 = smov 8  }
  0x33   :  { %48 = dma.hbm_to_vmem [thread:$0]  %s1215_s3, 2048, %s43_s10, [#allocation6], %s1120_s0, %s1120_s0, %s1121_s28  }
  0x34   :  { %1109 = dma.done.wait [#allocation3], 448  }
  0x35   :  { %1110 = vsyncadd [#allocation3], 4294966848 }
  0x36   :  { %1111 = dma.done.wait [#allocation6], 8320  }
  0x37   :  { %1112 = vsyncadd [#allocation6], 4294958976  ;;  %v969_v0 = vld [vmem:[#allocation5 + $0x40] sm:$0xff]   ;;  %v973_v4 = vld [vmem:[#allocation5 + $0x48] sm:$0xff]   ;;  %v1122_v42 = vmov 0.0   ;;  %vm1123_vm0 = vmmov 0  }
  0x38   :  { %v970_v1 = vld [vmem:[#allocation5] sm:$0xff]   ;;  %808 = vmatprep.subr.bf16.mxu0 %v969_v0  ;;  %v974_v5 = vld [vmem:[#allocation5 + $0x8] sm:$0xff]   ;;  %v977_v8 = vld [vmem:[#allocation5 + $0x50] sm:$0xff]   ;;  %vm480_vm1 = vcmask 130048   ;;  %s1125_s8 = smov [#allocation8]  }
  0x39   :  { %v971_v2 = vld [vmem:[#allocation5 + $0xc0] sm:$0xff]   ;;  %809 = vmatpush3.bf16.msra.mxu0 %v970_v1  ;;  %v975_v6 = vld [vmem:[#allocation5 + $0xc8] sm:$0xff]   ;;  %v978_v9 = vld [vmem:[#allocation5 + $0x10] sm:$0xff]   ;;  %s746_s9 = sshll.u32 %s1125_s8, 4  ;;  %s747_s9 = int_to_ptr.vmem [resolvable:$true] %s746_s9 }
  0x3a   :  { %v972_v3 = vld [vmem:[#allocation5 + $0x80] sm:$0xff]   ;;  %830 = vmatprep.subr.bf16.mxu1 %v971_v2  ;;  %810 = vmatprep.subr.bf16.mxu0 %v973_v4  ;;  %v976_v7 = vld [vmem:[#allocation5 + $0x88] sm:$0xff]   ;;  %v979_v10 = vld [vmem:[#allocation5 + $0xd0] sm:$0xff]   ;;  %s1087_s10 = scalar_lea.vmem %s747_s9, 32  ;;  %p1092_p11 = scmp.lt.s32.totalorder %s747_s9, %s747_s9 }
  0x3b   :  { %831 = vmatpush3.bf16.msra.mxu1 %v972_v3  ;;  %v980_v11 = vld [vmem:[#allocation5 + $0x90] sm:$0xff]   ;;  %v981_v12 = vld [vmem:[#allocation5 + $0x58] sm:$0xff]   ;;  %v985_v16 = vld [vmem:[#allocation5 + $0x60] sm:$0xff]   ;;  %v1124_v3 = vmov 0.0|0.0   ;;  %p1088_p10 = scmp.ne.s32.totalorder %s747_s9, %s1087_s10  ;;  %p1093_p12 = scmp.lt.s32.totalorder %s1087_s10, %s1087_s10 }
  0x3c   :  { %832 = vmatprep.subr.bf16.mxu1 %v975_v6  ;;  %v982_v13 = vld [vmem:[#allocation5 + $0x18] sm:$0xff]   ;;  %v986_v17 = vld [vmem:[#allocation5 + $0x20] sm:$0xff]   ;;  %v989_v20 = vld [vmem:[#allocation5 + $0x68] sm:$0xff]  }
  0x3d   :  { %811 = vmatpush3.bf16.msra.mxu0 %v974_v5  ;;  %v983_v14 = vld [vmem:[#allocation5 + $0xd8] sm:$0xff]   ;;  %v987_v18 = vld [vmem:[#allocation5 + $0xe0] sm:$0xff]   ;;  %v990_v21 = vld [vmem:[#allocation5 + $0x28] sm:$0xff]   ;;  %p1094_p13 = por %p1093_p12, %p1092_p11 }
  0x3e   :  { %812 = vmatprep.subr.bf16.mxu0 %v977_v8  ;;  %v984_v15 = vld [vmem:[#allocation5 + $0x98] sm:$0xff]   ;;  %v988_v19 = vld [vmem:[#allocation5 + $0xa0] sm:$0xff]   ;;  %v991_v22 = vld [vmem:[#allocation5 + $0xe8] sm:$0xff]  }
  0x3f   :  { %833 = vmatpush3.bf16.msra.mxu1 %v976_v7  ;;  %v992_v23 = vld [vmem:[#allocation5 + $0xa8] sm:$0xff]   ;;  %v993_v24 = vld [vmem:[#allocation5 + $0x70] sm:$0xff]   ;;  %v997_v28 = vld [vmem:[#allocation5 + $0x78] sm:$0xff]   ;;  %p1095_p0 = pnand %p1094_p13, %p1088_p10 }
  0x40   :  { %834 = vmatprep.subr.bf16.mxu1 %v979_v10  ;;  %v994_v25 = vld [vmem:[#allocation5 + $0x30] sm:$0xff]   ;;  %v998_v29 = vld [vmem:[#allocation5 + $0x38] sm:$0xff]   ;;  %v61_v31 = vld [vmem:[#allocation2] sm:$0xff] }
  0x41   :  { %813 = vmatpush3.bf16.msra.mxu0 %v978_v9  ;;  %v995_v26 = vld [vmem:[#allocation5 + $0xf0] sm:$0xff]   ;;  %v999_v30 = vld [vmem:[#allocation5 + $0xf8] sm:$0xff]   ;;  %v68_v32 = vcombine.high %v61_v31, %v61_v31  ;;  %v74_v34 = vpack.c.bf16 %v61_v31, %v61_v31  ;;  %v1002_v35 = vld [vmem:[#allocation5 + $0x140] sm:$0xff]  }
  0x42   :  { %814 = vmatprep.subr.bf16.mxu0 %v981_v12  ;;  %v996_v27 = vld [vmem:[#allocation5 + $0xb0] sm:$0xff]   ;;  %v1001_v33 = vld [vmem:[#allocation5 + $0xb8] sm:$0xff]   ;;  %v1004_v39 = vld [vmem:[#allocation5 + $0x100] sm:$0xff]  }
  0x43   :  { %835 = vmatpush3.bf16.msra.mxu1 %v980_v11  ;;  %v62_v36 = vld [vmem:[#allocation2 + $0x8] sm:$0xff]  ;;  %v75_v37 = vpack.c.bf16 %v68_v32, %v68_v32  ;;  %v1009_v47 = vld [vmem:[#allocation5 + $0x158] sm:$0xff]   ;;  %v1011_v49 = vld [vmem:[#allocation5 + $0x160] sm:$0xff]  }
  0x44   :  { %836 = vmatprep.subr.bf16.mxu1 %v983_v14  ;;  %v69_v38 = vcombine.high %v62_v36, %v62_v36  ;;  %v76_v40 = vpack.c.bf16 %v62_v36, %v62_v36  ;;  %v1005_v41 = vld [vmem:[#allocation5 + $0x148] sm:$0xff]   ;;  %v1007_v45 = vld [vmem:[#allocation5 + $0x150] sm:$0xff]   ;;  %v1010_v48 = vld [vmem:[#allocation5 + $0x118] sm:$0xff]  }
  0x45   :  { %815 = vmatpush3.bf16.msra.mxu0 %v982_v13  ;;  %516 = vmatprep.mubr.bf16.mxu0 %v75_v37  ;;  %v1006_v44 = vld [vmem:[#allocation5 + $0x108] sm:$0xff]   ;;  %v1008_v46 = vld [vmem:[#allocation5 + $0x110] sm:$0xff]   ;;  %v1019_v50 = vld [vmem:[#allocation5 + $0x180] sm:$0xff]  }
  0x46   :  { %816 = vmatprep.subr.bf16.mxu0 %v985_v16  ;;  %v77_v43 = vpack.c.bf16 %v69_v38, %v69_v38  ;;  %v63_v51 = vld [vmem:[#allocation2 + $0x10] sm:$0xff]  ;;  %v1012_v52 = vld [vmem:[#allocation5 + $0x120] sm:$0xff]   ;;  %v64_v54 = vld [vmem:[#allocation2 + $0x18] sm:$0xf] }
  0x47   :  { %837 = vmatpush3.bf16.msra.mxu1 %v984_v15  ;;  %v70_v53 = vcombine.high %v63_v51, %v63_v51  ;;  %v1013_v55 = vld [vmem:[#allocation5 + $0x168] sm:$0xff]   ;;  %v80_v56 = vpack.c.bf16 %v64_v54, %v64_v54  ;;  %v1015_v59 = vld [vmem:[#allocation5 + $0x170] sm:$0xff]   ;;  %v1017_v61 = vld [vmem:[#allocation5 + $0x178] sm:$0xff]   ;;  %v78_v63 = vpack.c.bf16 %v63_v51, %v63_v51 }
  0x48   :  { %838 = vmatprep.subr.bf16.mxu1 %v987_v18  ;;  %556 = vmatprep.mubr.bf16.mxu1 %v77_v43  ;;  %v1014_v58 = vld [vmem:[#allocation5 + $0x128] sm:$0xff]   ;;  %v1016_v60 = vld [vmem:[#allocation5 + $0x130] sm:$0xff]   ;;  %v1018_v62 = vld [vmem:[#allocation5 + $0x138] sm:$0xff]  }
  0x49   :  { %817 = vmatpush3.bf16.msra.mxu0 %v986_v17  ;;  %v79_v57 = vpack.c.bf16 %v70_v53, %v70_v53  ;;  %v645_v0 = vld [vmem:[#allocation7] sm:$0xff]  ;;  %v646_v1 = vld [vmem:[#allocation7 + $0x8] sm:$0xff]  ;;  %v647_v2 = vld [vmem:[#allocation7 + $0x10] sm:$0xff] }
  0x4a   :  { %818 = vmatprep.subr.bf16.mxu0 %v989_v20  ;;  %v935_v4 = vpack.c.bf16 %v646_v1, %v645_v0  ;;  %v648_v5 = vld [vmem:[#allocation7 + $0x18] sm:$0xff]  ;;  %v649_v7 = vld [vmem:[#allocation7 + $0x20] sm:$0xff]  ;;  %v650_v8 = vld [vmem:[#allocation7 + $0x28] sm:$0xff] }
  0x4b   :  { %839 = vmatpush3.bf16.msra.mxu1 %v988_v19  ;;  %v938_v6 = vpack.c.bf16 %v648_v5, %v647_v2  ;;  %v941_v9 = vpack.c.bf16 %v650_v8, %v649_v7  ;;  %v651_v10 = vld [vmem:[#allocation7 + $0x30] sm:$0xff]  ;;  %v652_v11 = vld [vmem:[#allocation7 + $0x38] sm:$0xff]  ;;  %v653_v13 = vld [vmem:[#allocation7 + $0x40] sm:$0xff] }
  0x4c   :  { %840 = vmatprep.subr.bf16.mxu1 %v991_v22  ;;  %v944_v12 = vpack.c.bf16 %v652_v11, %v651_v10  ;;  %v654_v14 = vld [vmem:[#allocation7 + $0x48] sm:$0xff]  ;;  %v655_v16 = vld [vmem:[#allocation7 + $0x50] sm:$0xff]  ;;  %v656_v17 = vld [vmem:[#allocation7 + $0x58] sm:$0xff] }
  0x4d   :  { %819 = vmatpush3.bf16.msra.mxu0 %v990_v21  ;;  %v947_v15 = vpack.c.bf16 %v654_v14, %v653_v13  ;;  %v950_v18 = vpack.c.bf16 %v656_v17, %v655_v16  ;;  %v657_v19 = vld [vmem:[#allocation7 + $0x60] sm:$0xff]  ;;  %v658_v20 = vld [vmem:[#allocation7 + $0x68] sm:$0xff]  ;;  %v659_v22 = vld [vmem:[#allocation7 + $0x70] sm:$0xff] }
  0x4e   :  { %820 = vmatprep.subr.bf16.mxu0 %v993_v24  ;;  %v953_v21 = vpack.c.bf16 %v658_v20, %v657_v19 }
  0x4f   :  { %841 = vmatpush3.bf16.msra.mxu1 %v992_v23  ;;  %v660_v23 = vld [vmem:[#allocation7 + $0x78] sm:$0xff] }
  0x50   :  { %842 = vmatprep.subr.bf16.mxu1 %v995_v26  ;;  %v956_v24 = vpack.c.bf16 %v660_v23, %v659_v22  ;;  %v756_v26 = vld [vmem:[%s1214_s2] ss:$0 sm:$0xff] }
  0x51   :  { %821 = vmatpush3.bf16.msra.mxu0 %v994_v25 }
  0x52   :  { %822 = vmatprep.subr.bf16.mxu0 %v997_v28 }
  0x53   :  { %843 = vmatpush3.bf16.msra.mxu1 %v996_v27 }
  0x54   :  { %844 = vmatprep.subr.bf16.mxu1 %v999_v30 }
  0x55   :  { %823 = vmatpush3.bf16.msra.mxu0 %v998_v29 }
  0x56   :  { %852 = vmatprep.subr.bf16.mxu0 %v1002_v35 }
  0x57   :  { %845 = vmatpush3.bf16.msra.mxu1 %v1001_v33 }
  0x58   :  { %893 = vmatprep.subr.bf16.mxu1 %v1122_v42  ;;  %517 = vmatmul.mubr.bf16.vlgmr.msra.gmra.mrb[0].mxu0 %v74_v34 }
  0x59   :  { %853 = vmatpush3.bf16.msra.mxu0 %v1004_v39  ;;  %596 = vmatprep.mubr.bf16.mxu0 %v79_v57 }
  0x5a   :  { %557 = vmatmul.mubr.bf16.vlgmr.msra.gmra.mrb[0].mxu1 %v76_v40  ;;  %854 = vmatprep.subr.bf16.mxu0 %v1005_v41 }
  0x5b   :  { %895 = vmatprep.mubr.msk.bf16.mxu1 %vm1123_vm0, %v1122_v42  ;;  %894 = vmatpush3.bf16.msra.mxu1 %v1019_v50  ;;  %v807_v50 = vld [vmem:[%s1216_s4] ss:$0 sm:$0xff] }
  0x5c   :  { %934 = vmatprep.subr.bf16.mxu1 %v1124_v3 }
  0x5d   :  { %855 = vmatpush3.bf16.msra.mxu0 %v1006_v44 }
  0x5e   :  { %856 = vmatprep.subr.bf16.mxu0 %v1007_v45 }
  0x61   :  { %857 = vmatpush3.bf16.msra.mxu0 %v1008_v46 }
  0x62   :  { %858 = vmatprep.subr.bf16.mxu0 %v1009_v47  ;;  %896 = vmatmul.mubr.msk.bf16.vlgmr.msra.gmra.mrb[4].mxu1 %vm480_vm1, %v80_v56 }
  0x63   :  { %931 = vmatprep.mubr.msk.f32.mxu1 %vm1123_vm0, %v1122_v42  ;;  %936 = vmatpush3.bf16.msra.mxu1 %v935_v4 }
  0x64   :  { %937 = vmatprep.subr.bf16.mxu1 %v1124_v3 }
  0x65   :  { %859 = vmatpush3.bf16.msra.mxu0 %v1010_v48 }
  0x66   :  { %860 = vmatprep.subr.bf16.mxu0 %v1011_v49 }
  0x67   :  { %939 = vmatpush3.bf16.msra.mxu1 %v938_v6 }
  0x68   :  { %940 = vmatprep.subr.bf16.mxu1 %v1124_v3 }
  0x69   :  { %861 = vmatpush3.bf16.msra.mxu0 %v1012_v52 }
  0x6a   :  { %862 = vmatprep.subr.bf16.mxu0 %v1013_v55 }
  0x6b   :  { %942 = vmatpush3.bf16.msra.mxu1 %v941_v9 }
  0x6c   :  { %943 = vmatprep.subr.bf16.mxu1 %v1124_v3 }
  0x6d   :  { %863 = vmatpush3.bf16.msra.mxu0 %v1014_v58 }
  0x6e   :  { %864 = vmatprep.subr.bf16.mxu0 %v1015_v59 }
  0x6f   :  { %945 = vmatpush3.bf16.msra.mxu1 %v944_v12 }
  0x70   :  { %946 = vmatprep.subr.bf16.mxu1 %v1124_v3 }
  0x71   :  { %865 = vmatpush3.bf16.msra.mxu0 %v1016_v60 }
  0x72   :  { %866 = vmatprep.subr.bf16.mxu0 %v1017_v61 }
  0x73   :  { %948 = vmatpush3.bf16.msra.mxu1 %v947_v15 }
  0x74   :  { %949 = vmatprep.subr.bf16.mxu1 %v1124_v3 }
  0x75   :  { %867 = vmatpush3.bf16.msra.mxu0 %v1018_v62 }
  0x77   :  { %951 = vmatpush3.bf16.msra.mxu1 %v950_v18 }
  0x78   :  { %597 = vmatmul.mubr.bf16.vlgmr.msra.gmra.mrb[4].mxu0 %v78_v63  ;;  %952 = vmatprep.subr.bf16.mxu1 %v1124_v3 }
  0x7b   :  { %954 = vmatpush3.bf16.msra.mxu1 %v953_v21 }
  0x7c   :  { %955 = vmatprep.subr.bf16.mxu1 %v1124_v3 }
  0x7f   :  { %957 = vmatpush3.bf16.msra.mxu1 %v956_v24 }
 0x12b   :  { %v824_v25 = vpop.f32.mrb[0].mxu0 }
 0x12c   :  { %v825_v27 = vpop.f32.mrb[1].mxu0 }
 0x12d   :  { %v826_v28 = vadd.f32 %v825_v27, %v824_v25  ;;  %v827_v29 = vpop.f32.mrb[2].mxu0  ;;  %v846_v30 = vpop.f32.mrb[0].mxu1 }
 0x12e   :  { %v828_v31 = vpop.f32.mrb[3].mxu0  ;;  %v847_v32 = vpop.f32.mrb[1].mxu1 }
 0x12f   :  { %v519_v33 = vadd.f32 %v826_v28, %v756_v26  ;;  %v848_v34 = vadd.f32 %v847_v32, %v846_v30  ;;  %v849_v35 = vpop.f32.mrb[2].mxu1 }
 0x130   :  { %v850_v36 = vpop.f32.mrb[3].mxu1 }
 0x131   :  { %v559_v37 = vadd.f32 %v848_v34, %v519_v33 }
 0x135   :  { %v638_v38 = vpop.f32.mrb[4].mxu1 }
 0x136   :  { %v897_v39 = vpop.f32.mrb[5].mxu1 }
 0x137   :  { %v641_v40 = vpop.f32.mrb[6].mxu1 }
 0x138   :  { %v898_v41 = vpop.f32.mrb[7].mxu1 }
 0x14b   :  { %v868_v42 = vpop.f32.mrb[4].mxu0 }
 0x14c   :  { %v869_v43 = vpop.f32.mrb[5].mxu0 }
 0x14d   :  { %v870_v44 = vadd.f32 %v869_v43, %v868_v42  ;;  %v871_v45 = vpop.f32.mrb[6].mxu0 }
 0x14e   :  { %v872_v46 = vpop.f32.mrb[7].mxu0 }
 0x14f   :  { %v599_v47 = vadd.f32 %v870_v44, %v559_v37 }
 0x151   :  { %v639_v48 = vadd.f32 %v638_v38, %v599_v47 }
 0x153   :  { %v644_v49 = vmax.f32 %v639_v48, 0.0 }
 0x155   :  { %932 = vmatmul.mubr.f32.vlgmr.msra.gmra.mrb[8].mxu1 %v644_v49 }
 0x228   :  { %v734_v51 = vpop.f32.mrb[8].mxu1 }
 0x229   :  { %v735_v52 = vadd.f32 %v807_v50, %v734_v51  ;;  %v933_v53 = vpop.f32.mrb[9].mxu1 }
 0x22b   :  { %v738_v54 = vpack.c.bf16 %v735_v52, %v735_v52 }
 0x22d   :  { %739 = vst [vmem:[#allocation8] sm:$0x3] %v738_v54 }
 0x22e   :  { %1098 = shalt.err (!%p1095_p0)
}
 0x22f   :  { %s1099_s13 = scalar_lea.hbm %s1217_s5, 32 }
 0x230   :  { %p1100_p1 = scmp.ne.s32.totalorder %s1217_s5, %s1099_s13  ;;  %p1103_p2 = scmp.lt.u32.totalorder %s1099_s13, %s1217_s5 }
 0x232   :  { %p1105_p3 = pnand %p1103_p2, %p1100_p1 }
 0x234   :  { %1108 = shalt.err (!%p1105_p3)
}
 0x235   :  { %749 = dma.vmem_to_hbm [thread:$0]  %s747_s9, 32, %s1217_s5, [#allocation4]  }
 0x236   :  { %1113 = dma.done.wait [#allocation4], 32  }
 0x237   :  { %1114 = vsyncadd [#allocation4], 4294967264 }
 0x238   :  { %753 = vsyncpa [#allocation3], 1 }
 0x239   :  { %754 = vsyncpa [#allocation6], 1 }
 0x23a   :  { %755 = vsyncpa [#allocation4], 1 }

</bundles_post_ra>
